<compile_context>
chip_gen: v5e
topology: v5e:2x2
jax: 0.10.0
libtpu: 0.0.40
codegen_flags: <defaults>
</compile_context>

<pallas_src>
import functools

import jax
import jax.numpy as jnp
from jax import lax
from jax.experimental import pallas as pl
from jax.experimental.pallas import tpu as pltpu

_EPS = 1e-5
_HPAD = 128  # hidden width (64) zero-padded to a full 128-lane register


def _round_up(x, m):
    return (x + m - 1) // m * m


# ---------------------------------------------------------------------------
# Pass 1: per-tile fc1 + ReLU, accumulate batch sum / sum-of-squares (1, 128).
# ---------------------------------------------------------------------------
def _stats_kernel(x_ref, w1_ref, b1_ref, sum_ref, sq_ref, *, n_valid, tile_n):
    i = pl.program_id(0)

    @pl.when(i == 0)
    def _init():
        sum_ref[...] = jnp.zeros_like(sum_ref)
        sq_ref[...] = jnp.zeros_like(sq_ref)

    h = jnp.dot(x_ref[...], w1_ref[...], preferred_element_type=jnp.float32)
    h = jnp.maximum(h + b1_ref[...], 0.0)

    # Zero rows that are batch padding so they don't pollute the statistics.
    row_g = lax.broadcasted_iota(jnp.int32, h.shape, 0) + i * tile_n
    h = jnp.where(row_g < n_valid, h, 0.0)

    sum_ref[...] += jnp.sum(h, axis=0, keepdims=True)
    sq_ref[...] += jnp.sum(h * h, axis=0, keepdims=True)


# ---------------------------------------------------------------------------
# Pass 2: fc1 + ReLU + BatchNorm (global stats) + dropout + fc3 per row tile.
# ---------------------------------------------------------------------------
def _fwd_kernel(x_ref, w1_ref, b1_ref, g_ref, be_ref, w3_ref, sum_ref, sq_ref,
                seed_ref, b3_ref, o_ref, *, n_valid, tile_n, drop):
    i = pl.program_id(0)

    # fc_1 + ReLU
    h = jnp.dot(x_ref[...], w1_ref[...], preferred_element_type=jnp.float32)
    h = jnp.maximum(h + b1_ref[...], 0.0)

    # BatchNorm1d(64), training mode: biased batch variance from pass-1 sums.
    inv_n = jnp.float32(1.0 / n_valid)
    mean = sum_ref[...] * inv_n
    var = jnp.maximum(sq_ref[...] * inv_n - mean * mean, 0.0)
    scale = g_ref[...] * lax.rsqrt(var + jnp.float32(_EPS))
    shift = be_ref[...] - mean * scale
    hn = h * scale + shift

    # Inverted dropout: integer-threshold compare on a counter hash (per-element,
    # distinct across tiles via the global row index). Scale fused into the select.
    if drop > 0.0:
        thresh24 = int(round(drop * (1 << 24)))
        row_g = lax.broadcasted_iota(jnp.int32, hn.shape, 0) + i * tile_n
        col = lax.broadcasted_iota(jnp.int32, hn.shape, 1)
        ctr = row_g * jnp.int32(hn.shape[1]) + col + seed_ref[0] * jnp.int32(1000003)
        z = ctr.astype(jnp.uint32)
        z = (z ^ (z >> 16)) * jnp.uint32(0x45D9F3B)
        z = (z ^ (z >> 16)) * jnp.uint32(0x45D9F3B)
        z = z ^ (z >> 16)
        keep = (z >> 8).astype(jnp.int32) >= jnp.int32(thresh24)
        hn = jnp.where(keep, hn * jnp.float32(1.0 / (1.0 - drop)), 0.0)

    # fc_3 (padded 128 -> 1) as VPU multiply + lane reduction; store lane-dense.
    y = jnp.sum(hn * w3_ref[...], axis=1) + b3_ref[0]
    o_ref[...] = y.reshape(1, tile_n).astype(o_ref.dtype)


def mlp_forward(x, w1, b1, gamma, beta, w3, b3, *, drop=0.3, seed=0, block_rows=512):
    """x: (N, dim) f32; w1: (64, dim); b1,gamma,beta: (64,); w3: (1, 64); b3: (1,).
    Returns (N, 1) f32 (train-mode BN + active dropout, matching module defaults)."""
    x = jnp.asarray(x, jnp.float32)
    N, dim = x.shape
    h_in = w1.shape[0]
    H = _HPAD

    # Pad hidden 64 -> 128 (zero cols are inert through ReLU / BN-affine / fc3).
    w1_t = jnp.zeros((dim, H), jnp.float32).at[:, :h_in].set(jnp.asarray(w1, jnp.float32).T)
    b1_r = jnp.zeros((1, H), jnp.float32).at[:, :h_in].set(jnp.asarray(b1, jnp.float32))
    g_r = jnp.ones((1, H), jnp.float32).at[:, :h_in].set(jnp.asarray(gamma, jnp.float32))
    be_r = jnp.zeros((1, H), jnp.float32).at[:, :h_in].set(jnp.asarray(beta, jnp.float32))
    w3_r = jnp.zeros((1, H), jnp.float32).at[:, :h_in].set(
        jnp.asarray(w3, jnp.float32).reshape(1, h_in))
    b3_s = jnp.asarray(b3, jnp.float32).reshape(1)
    seed_s = jnp.asarray([seed], jnp.int32)

    # Row tiling: sublane-aligned; when more than one tile, tile_n is a multiple
    # of 128 so the lane-dense (1, tile_n) output block stays (8,128)-legal.
    n8 = _round_up(N, 8)
    tile_n = n8 if n8 <= block_rows else _round_up(block_rows, 128)
    n_pad = _round_up(N, tile_n)
    num_tiles = n_pad // tile_n
    x_p = jnp.zeros((n_pad, dim), jnp.float32).at[:N].set(x)

    x_spec = pl.BlockSpec((tile_n, dim), lambda i: (i, 0))
    w1_spec = pl.BlockSpec((dim, H), lambda i: (0, 0))
    vec_spec = pl.BlockSpec((1, H), lambda i: (0, 0))
    smem_spec = pl.BlockSpec(memory_space=pltpu.MemorySpace.SMEM)

    # ---- Pass 1: batch statistics (reduction over the row-tile grid axis) ----
    sums, sqs = pl.pallas_call(
        functools.partial(_stats_kernel, n_valid=N, tile_n=tile_n),
        grid=(num_tiles,),
        in_specs=[x_spec, w1_spec, vec_spec],
        out_specs=[vec_spec, vec_spec],
        out_shape=[jax.ShapeDtypeStruct((1, H), jnp.float32),
                   jax.ShapeDtypeStruct((1, H), jnp.float32)],
        compiler_params=pltpu.CompilerParams(dimension_semantics=("arbitrary",)),
    )(x_p, w1_t, b1_r)

    # ---- Pass 2: normalize + dropout + fc_3, streamed over row tiles ----
    out_slab = pl.pallas_call(
        functools.partial(_fwd_kernel, n_valid=N, tile_n=tile_n, drop=float(drop)),
        grid=(num_tiles,),
        in_specs=[x_spec, w1_spec, vec_spec, vec_spec, vec_spec, vec_spec,
                  vec_spec, vec_spec, smem_spec, smem_spec],
        out_specs=pl.BlockSpec((1, tile_n), lambda i: (0, i)),
        out_shape=jax.ShapeDtypeStruct((1, n_pad), jnp.float32),
        compiler_params=pltpu.CompilerParams(dimension_semantics=("parallel",)),
    )(x_p, w1_t, b1_r, g_r, be_r, w3_r, sums, sqs, seed_s, b3_s)

    return out_slab[0, :N].reshape(N, 1)


def _reference_no_dropout(x, w1, b1, gamma, beta, w3, b3):
    h = jnp.maximum(x @ w1.T + b1, 0.0)
    mean = h.mean(axis=0, keepdims=True)
    var = ((h - mean) ** 2).mean(axis=0, keepdims=True)
    hn = (h - mean) / jnp.sqrt(var + _EPS) * gamma + beta
    return hn @ w3.T + b3


if __name__ == "__main__":
    key = jax.random.PRNGKey(0)
    N, dim, hidden = 256, 32, 64
    k1, k2, k3, k4, k5 = jax.random.split(key, 5)

    x = jax.random.normal(k1, (N, dim), jnp.float32)

    # fc_1: xavier_normal_ weight, default PyTorch uniform bias
    std1 = (2.0 / (dim + hidden)) ** 0.5
    w1 = jax.random.normal(k2, (hidden, dim), jnp.float32) * std1
    b1 = jax.random.uniform(k3, (hidden,), jnp.float32,
                            minval=-1.0 / dim ** 0.5, maxval=1.0 / dim ** 0.5)
    # fc_3: xavier_normal_ weight, default PyTorch uniform bias
    std3 = (2.0 / (hidden + 1)) ** 0.5
    w3 = jax.random.normal(k4, (1, hidden), jnp.float32) * std3
    b3 = jax.random.uniform(k5, (1,), jnp.float32,
                            minval=-1.0 / hidden ** 0.5, maxval=1.0 / hidden ** 0.5)
    # BatchNorm1d affine params (default init)
    gamma = jnp.ones((hidden,), jnp.float32)
    beta = jnp.zeros((hidden,), jnp.float32)

    # Dropout active (p=0.3). block_rows=128 -> 2 row tiles, exercising the
    # tiled two-pass BatchNorm and the per-tile dropout masks.
    out = mlp_forward(x, w1, b1, gamma, beta, w3, b3, drop=0.3, seed=0, block_rows=128)
    jax.block_until_ready(out)
    assert out.shape == (N, 1)
    assert bool(jnp.all(jnp.isfinite(out)))

    # Deterministic correctness check (dropout disabled) vs pure-JAX reference.
    out0 = mlp_forward(x, w1, b1, gamma, beta, w3, b3, drop=0.0, seed=0, block_rows=128)
    ref0 = _reference_no_dropout(x, w1, b1, gamma, beta, w3, b3)
    jax.block_until_ready(out0)
    err = float(jnp.max(jnp.abs(out0 - ref0)))
    assert err < 5e-3, f"max abs err {err}"

    # Dropout sanity: the dropped-out forward must differ from the no-drop one.
    assert float(jnp.max(jnp.abs(out - out0))) > 0.0

    print("KERNEL_OK")
</pallas_src>

<mosaic_0001>
module attributes {stable_mosaic.version = 11 : i64} {
  func.func @_stats_kernel(%arg0: i32, %arg1: memref<128x32xf32, #tpu.memory_space<vmem>>, %arg2: memref<32x128xf32, #tpu.memory_space<vmem>>, %arg3: memref<1x128xf32, #tpu.memory_space<vmem>>, %arg4: memref<1x128xf32, #tpu.memory_space<vmem>>, %arg5: memref<1x128xf32, #tpu.memory_space<vmem>>) attributes {dimension_semantics = [#tpu.dimension_semantics<arbitrary>], iteration_bounds = array<i64: 2>, scalar_prefetch = 0 : i64, scratch_operands = 0 : i64, tpu.core_type = #tpu.core_type<tc>, window_params = [{transform_indices = @transform_0, window_bounds = array<i64: 128, 32>}, {pipeline_mode = #tpu.pipeline_mode<synchronous>, transform_indices = @transform_1, window_bounds = array<i64: 32, 128>}, {pipeline_mode = #tpu.pipeline_mode<synchronous>, transform_indices = @transform_2, window_bounds = array<i64: 1, 128>}, {pipeline_mode = #tpu.pipeline_mode<synchronous>, transform_indices = @transform_3, window_bounds = array<i64: 1, 128>}, {pipeline_mode = #tpu.pipeline_mode<synchronous>, transform_indices = @transform_4, window_bounds = array<i64: 1, 128>}]} {
    %c0_i32 = arith.constant 0 : i32
    %0 = arith.cmpi eq, %arg0, %c0_i32 : i32
    %1 = arith.extui %0 : i1 to i32
    %c0_i32_0 = arith.constant 0 : i32
    %2 = arith.cmpi ne, %1, %c0_i32_0 : i32
    scf.if %2 {
      %cst_18 = arith.constant 0.000000e+00 : f32
      %30 = vector.broadcast %cst_18 : f32 to vector<1x128xf32>
      %c0_19 = arith.constant 0 : index
      %c0_20 = arith.constant 0 : index
      %31 = vector.load %arg4[%c0_19, %c0_20] : memref<1x128xf32, #tpu.memory_space<vmem>>, vector<1x128xf32>
      tpu.vector_store %arg4[%c0_19, %c0_20], %30 {strides = array<i32>} : memref<1x128xf32, #tpu.memory_space<vmem>>, vector<1x128xf32>,
      %cst_21 = arith.constant 0.000000e+00 : f32
      %32 = vector.broadcast %cst_21 : f32 to vector<1x128xf32>
      %c0_22 = arith.constant 0 : index
      %c0_23 = arith.constant 0 : index
      %33 = vector.load %arg5[%c0_22, %c0_23] : memref<1x128xf32, #tpu.memory_space<vmem>>, vector<1x128xf32>
      tpu.vector_store %arg5[%c0_22, %c0_23], %32 {strides = array<i32>} : memref<1x128xf32, #tpu.memory_space<vmem>>, vector<1x128xf32>,
    } else {
    }
    %c0 = arith.constant 0 : index
    %c0_1 = arith.constant 0 : index
    %3 = vector.load %arg1[%c0, %c0_1] : memref<128x32xf32, #tpu.memory_space<vmem>>, vector<128x32xf32>
    %c0_2 = arith.constant 0 : index
    %c0_3 = arith.constant 0 : index
    %4 = vector.load %arg2[%c0_2, %c0_3] : memref<32x128xf32, #tpu.memory_space<vmem>>, vector<32x128xf32>
    %cst = arith.constant dense<0.000000e+00> : vector<128x128xf32>
    %5 = tpu.matmul %3, %4, %cst {dimension_numbers = #tpu.dot_dimension_numbers<[1], [0], [0], [1], [0, 0, 1, 1], [], []>} : vector<128x32xf32>, vector<32x128xf32>, vector<128x128xf32> -> vector<128x128xf32>
    %c0_4 = arith.constant 0 : index
    %c0_5 = arith.constant 0 : index
    %6 = vector.load %arg3[%c0_4, %c0_5] : memref<1x128xf32, #tpu.memory_space<vmem>>, vector<1x128xf32>
    %7 = vector.broadcast %6 : vector<1x128xf32> to vector<128x128xf32>
    %8 = arith.addf %5, %7 : vector<128x128xf32>
    %cst_6 = arith.constant 0.000000e+00 : f32
    %9 = vector.broadcast %cst_6 : f32 to vector<128x128xf32>
    %10 = arith.maximumf %8, %9 : vector<128x128xf32>
    %11 = tpu.iota {dimensions = array<i32: 0>} : vector<128x128xi32>
    %c128_i32 = arith.constant 128 : i32
    %12 = arith.muli %arg0, %c128_i32 : i32
    %13 = vector.broadcast %12 : i32 to vector<128x128xi32>
    %14 = arith.addi %11, %13 : vector<128x128xi32>
    %c256_i32 = arith.constant 256 : i32
    %15 = vector.broadcast %c256_i32 : i32 to vector<128x128xi32>
    %16 = arith.cmpi slt, %14, %15 : vector<128x128xi32>
    %cst_7 = arith.constant 0.000000e+00 : f32
    %17 = vector.broadcast %cst_7 : f32 to vector<128x128xf32>
    %18 = arith.select %16, %10, %17 : vector<128x128xi1>, vector<128x128xf32>
    %c0_8 = arith.constant 0 : index
    %c0_9 = arith.constant 0 : index
    %19 = vector.load %arg4[%c0_8, %c0_9] : memref<1x128xf32, #tpu.memory_space<vmem>>, vector<1x128xf32>
    %cst_10 = arith.constant dense<0.000000e+00> : vector<128xf32>
    %20 = vector.multi_reduction <add>, %18, %cst_10 [0] : vector<128x128xf32> to vector<128xf32>
    %21 = vector.shape_cast %20 : vector<128xf32> to vector<1x128xf32>
    %22 = arith.addf %19, %21 : vector<1x128xf32>
    %c0_11 = arith.constant 0 : index
    %c0_12 = arith.constant 0 : index
    %23 = vector.load %arg4[%c0_11, %c0_12] : memref<1x128xf32, #tpu.memory_space<vmem>>, vector<1x128xf32>
    tpu.vector_store %arg4[%c0_11, %c0_12], %22 {strides = array<i32>} : memref<1x128xf32, #tpu.memory_space<vmem>>, vector<1x128xf32>,
    %c0_13 = arith.constant 0 : index
    %c0_14 = arith.constant 0 : index
    %24 = vector.load %arg5[%c0_13, %c0_14] : memref<1x128xf32, #tpu.memory_space<vmem>>, vector<1x128xf32>
    %25 = arith.mulf %18, %18 : vector<128x128xf32>
    %cst_15 = arith.constant dense<0.000000e+00> : vector<128xf32>
    %26 = vector.multi_reduction <add>, %25, %cst_15 [0] : vector<128x128xf32> to vector<128xf32>
    %27 = vector.shape_cast %26 : vector<128xf32> to vector<1x128xf32>
    %28 = arith.addf %24, %27 : vector<1x128xf32>
    %c0_16 = arith.constant 0 : index
    %c0_17 = arith.constant 0 : index
    %29 = vector.load %arg5[%c0_16, %c0_17] : memref<1x128xf32, #tpu.memory_space<vmem>>, vector<1x128xf32>
    tpu.vector_store %arg5[%c0_16, %c0_17], %28 {strides = array<i32>} : memref<1x128xf32, #tpu.memory_space<vmem>>, vector<1x128xf32>,
    return
  }
  func.func @transform_0(%arg0: i32) -> (i32, i32) {
    %c0_i32 = arith.constant 0 : i32
    %c0_i32_0 = arith.constant 0 : i32
    return %arg0, %c0_i32 : i32, i32
  }
  func.func @transform_1(%arg0: i32) -> (i32, i32) {
    %c0_i32 = arith.constant 0 : i32
    %c0_i32_0 = arith.constant 0 : i32
    %c0_i32_1 = arith.constant 0 : i32
    return %c0_i32, %c0_i32_0 : i32, i32
  }
  func.func @transform_2(%arg0: i32) -> (i32, i32) {
    %c0_i32 = arith.constant 0 : i32
    %c0_i32_0 = arith.constant 0 : i32
    %c0_i32_1 = arith.constant 0 : i32
    return %c0_i32, %c0_i32_0 : i32, i32
  }
  func.func @transform_3(%arg0: i32) -> (i32, i32) {
    %c0_i32 = arith.constant 0 : i32
    %c0_i32_0 = arith.constant 0 : i32
    %c0_i32_1 = arith.constant 0 : i32
    return %c0_i32, %c0_i32_0 : i32, i32
  }
  func.func @transform_4(%arg0: i32) -> (i32, i32) {
    %c0_i32 = arith.constant 0 : i32
    %c0_i32_0 = arith.constant 0 : i32
    %c0_i32_1 = arith.constant 0 : i32
    return %c0_i32, %c0_i32_0 : i32, i32
  }
}

</mosaic_0001>

<bundles_post_ra>
// kernel: tpu_custom_call.1
= control target key start
LH: loop header
LB: loop body
LE: loop exit
PB: predicated region body
PF: predicated region fallthrough
CT: control target
= control target key end

     0   :  { %10 = vsyncpa [#allocation3], 0  ;;  %s883_s0 = inlined_call_operand.vmem [shape: f32[256,32], index: 0, kind: input, shape index: {}]   ;;  %s884_s1 = inlined_call_operand.vmem [shape: f32[32,128], index: 1, kind: input, shape index: {}]   ;;  %s885_s2 = inlined_call_operand.vmem [shape: f32[1,128], index: 2, kind: input, shape index: {}]   ;;  %s886_s3 = inlined_call_operand.hbm [shape: f32[1,128], index: 3, kind: output, shape index: {0}]   ;;  %s887_s4 = inlined_call_operand.hbm [shape: f32[1,128], index: 4, kind: output, shape index: {1}]  }
   0x1   :  { %11 = vsyncpa [#allocation5], 0  ;;  %s714_s15 = smov 0  }
   0x2 LB: > { %s720_s16 = sadd.s32 4294967295, %s684_s15   ;;  %p551_p0 = scmp.ge.s32.totalorder %s684_s15, 1  ;;  %s684_s15 = sphi %s714_s15, %s17_s15  }
   0x3   : > { %p158_p1 = scmp.lt.s32.totalorder %s684_s15, 3 }
   0x5   : > { %p159_p2 = pnand %p551_p0, %p158_p1 }
   0x6   : > { %s552_s17 = sshll.u32 (!%p159_p2), %s720_s16, 4  ;;  %p554_p4 = scmp.ne.s32.totalorder (!%p159_p2), %s720_s16, 0 }
   0x7   : > { %162 = sbr.rel (%p159_p2) target bundleno = 231 (0xe7), region = 32  ;;  %p180_p3 = scmp.lt.s32.totalorder (!%p159_p2), %s552_s17, 31 }
   0xc   : > { %s889_s17 = smov (!%p180_p3, %s552_s17), 31  ;;  %188 = sbr.rel (%p554_p4) target bundleno = 20 (0x14), region = 36 }
   0xd   : > { %s553_s18 = sshll.u32 %s889_s17, 3 }
   0xe   : > { %s728_s21 = scalar_lea.vmem %s883_s0, %s553_s18 }
  0x11   : > { %v686_v0 = vmov 0.0  }
  0x12   : > { %189 = vst [vmem:[#allocation2] sm:$0x1] %v686_v0 }
  0x13   : > { %190 = vst [vmem:[#allocation4] sm:$0x1] %v686_v0 }
  0x14 PF: > { %v210_v1 = vld [vmem:[%s884_s1 + $0x18] sm:$0xff]  ;;  %v209_v2 = vld [vmem:[%s884_s1 + $0x10] sm:$0xff]  ;;  %v208_v3 = vld [vmem:[%s884_s1 + $0x8] sm:$0xff]  ;;  %vm215_vm0 = vcmask 261120   ;;  %v345_v23 = vlaneseq  ;;  %s571_s30 = sshll.u32 %s720_s16, 7  ;;  %s687_s7 = smov [#allocation2]  }
  0x15   : > { %276 = vmatpush.msra.mxu0 %v210_v1  ;;  %578 = vmatpush.msra.mxu1 %v210_v1  ;;  %v207_v4 = vld [vmem:[%s884_s1] sm:$0xff]  ;;  %v192_v9 = vld [vmem:[%s728_s21 + $0x8] sm:$0xff]  ;;  %v193_v13 = vld [vmem:[%s728_s21 + $0x10] sm:$0xff]  ;;  %v788_v31 = vstv %s571_s30  ;;  %s482_s8 = sshll.u32 %s687_s7, 4  ;;  %s484_s11 = sshll.u32 %s886_s3, 4  ;;  %s483_s8 = int_to_ptr.vmem [resolvable:$true] %s482_s8  ;;  %s485_s11 = int_to_ptr.hbm [resolvable:$true] %s484_s11 }
  0x16   : > { %579 = vmatpush.msra.mxu2 %v210_v1  ;;  %580 = vmatpush.msra.mxu3 %v210_v1  ;;  %v191_v5 = vld [vmem:[%s728_s21] sm:$0xff]  ;;  %v196_v10 = vld [vmem:[%s728_s21 + $0x28] sm:$0xff]  ;;  %v197_v14 = vld [vmem:[%s728_s21 + $0x30] sm:$0xff]  ;;  %v775_v24 = vshrl.u32 %v345_v23, 7  ;;  %p598_p5 = scmp.eq.s32.totalorder %s720_s16, 1  ;;  %s688_s12 = smov [#allocation4]  }
  0x17   : > { %277 = vmatpush.msra.mxu0 %v209_v2  ;;  %581 = vmatpush.msra.mxu1 %v209_v2  ;;  %v195_v6 = vld [vmem:[%s728_s21 + $0x20] sm:$0xff]  ;;  %v200_v11 = vld [vmem:[%s728_s21 + $0x48] sm:$0xff]  ;;  %v201_v15 = vld [vmem:[%s728_s21 + $0x50] sm:$0xff]  ;;  %s494_s13 = sshll.u32 %s688_s12, 4  ;;  %s496_s18 = sshll.u32 %s887_s4, 4  ;;  %s495_s13 = int_to_ptr.vmem [resolvable:$true] %s494_s13  ;;  %s497_s18 = int_to_ptr.hbm [resolvable:$true] %s496_s18 }
  0x18   : > { %582 = vmatpush.msra.mxu2 %v209_v2  ;;  %583 = vmatpush.msra.mxu3 %v209_v2  ;;  %v199_v7 = vld [vmem:[%s728_s21 + $0x40] sm:$0xff]  ;;  %v204_v12 = vld [vmem:[%s728_s21 + $0x68] sm:$0xff]  ;;  %v205_v16 = vld [vmem:[%s728_s21 + $0x70] sm:$0xff]  ;;  %v347_v29 = vadd.s32 8, %v775_v24  ;;  %v348_v32 = vadd.s32 16, %v775_v24  ;;  %v350_v35 = vadd.s32 32, %v775_v24  ;;  %v364_v38 = vadd.s32 %v788_v31, %v775_v24 }
  0x19   : > { %278 = vmatpush.msra.mxu0 %v208_v3  ;;  %584 = vmatpush.msra.mxu1 %v208_v3  ;;  %v203_v8 = vld [vmem:[%s728_s21 + $0x60] sm:$0xff]  ;;  %v194_v17 = vld [vmem:[%s728_s21 + $0x18] sm:$0xff]  ;;  %v351_v36 = vadd.s32 40, %v775_v24  ;;  %v349_v44 = vadd.s32 24, %v775_v24  ;;  %v354_v48 = vadd.s32 64, %v775_v24  ;;  %v352_v52 = vadd.s32 48, %v775_v24 }
  0x1a   : > { %585 = vmatpush.msra.mxu2 %v208_v3  ;;  %586 = vmatpush.msra.mxu3 %v208_v3  ;;  %v198_v18 = vld [vmem:[%s728_s21 + $0x38] sm:$0xff]  ;;  %v786_v30 = vld [vmem:[%s885_s2] ss:$0 sm:$0xff]  ;;  %v365_v34 = vadd.s32 %v788_v31, %v347_v29  ;;  %v366_v40 = vadd.s32 %v788_v31, %v348_v32  ;;  %v368_v46 = vadd.s32 %v788_v31, %v350_v35  ;;  %vm380_vm2 = vcmp.lt.s32.totalorder %v364_v38, 256 }
  0x1b   : > { %279 = vmatpush.msra.mxu0 %v207_v4  ;;  %587 = vmatpush.msra.mxu1 %v207_v4  ;;  %v202_v19 = vld [vmem:[%s728_s21 + $0x58] sm:$0xff]  ;;  %v369_v47 = vadd.s32 %v788_v31, %v351_v36  ;;  %v355_v54 = vadd.s32 72, %v775_v24  ;;  %v358_v55 = vadd.s32 96, %v775_v24  ;;  %v367_v57 = vadd.s32 %v788_v31, %v349_v44 }
  0x1c   : > { %555 = vmatmul.msk.f32.vlgmr.msra.gmra.mxu0 %vm215_vm0, %v191_v5  ;;  %559 = vmatmul.msk.f32.vlgmr.msra.gmra.mxu1 %vm215_vm0, %v195_v6  ;;  %v206_v20 = vld [vmem:[%s728_s21 + $0x78] sm:$0xff]  ;;  %vm381_vm1 = vcmp.lt.s32.totalorder %v365_v34, 256  ;;  %vm382_vm3 = vcmp.lt.s32.totalorder %v366_v40, 256  ;;  %vm384_vm4 = vcmp.lt.s32.totalorder %v368_v46, 256  ;;  %v812_v58 = vadd.s32 %v788_v31, %v354_v48 }
  0x1d   : > { %588 = vmatpush.msra.mxu2 %v207_v4  ;;  %589 = vmatpush.msra.mxu3 %v207_v4  ;;  %vm385_vm5 = vcmp.lt.s32.totalorder %v369_v47, 256  ;;  %v353_v59 = vadd.s32 56, %v775_v24  ;;  %v370_v63 = vadd.s32 %v788_v31, %v352_v52  ;;  %v818_v3 = vadd.s32 %v788_v31, %v355_v54 }
  0x1e   : > { %563 = vmatmul.msk.f32.vlgmr.msra.gmra.mxu2 %vm215_vm0, %v199_v7  ;;  %567 = vmatmul.msk.f32.vlgmr.msra.gmra.mxu3 %vm215_vm0, %v203_v8  ;;  %v821_v4 = vadd.s32 %v788_v31, %v358_v55  ;;  %vm383_vm6 = vcmp.lt.s32.totalorder %v367_v57, 256  ;;  %vm388_vm7 = vcmp.lt.s32.totalorder %v812_v58, 256  ;;  %v359_v52 = vadd.s32 104, %v775_v24 }
  0x1f   : > { %vm386_vm8 = vcmp.lt.s32.totalorder %v370_v63, 256  ;;  %vm389_vm10 = vcmp.lt.s32.totalorder %v818_v3, 256 }
  0x20   : > { %vm392_vm11 = vcmp.lt.s32.totalorder %v821_v4, 256 }
  0x24   : > { %556 = vmatmul.msk.f32.gmra.mxu0 %vm215_vm0, %v192_v9  ;;  %560 = vmatmul.msk.f32.gmra.mxu1 %vm215_vm0, %v196_v10 }
  0x26   : > { %564 = vmatmul.msk.f32.gmra.mxu2 %vm215_vm0, %v200_v11  ;;  %568 = vmatmul.msk.f32.gmra.mxu3 %vm215_vm0, %v204_v12 }
  0x2c   : > { %557 = vmatmul.msk.f32.gmra.mxu0 %vm215_vm0, %v193_v13  ;;  %561 = vmatmul.msk.f32.gmra.mxu1 %vm215_vm0, %v197_v14  ;;  %v371_v13 = vadd.s32 %v788_v31, %v353_v59 }
  0x2e   : > { %565 = vmatmul.msk.f32.gmra.mxu2 %vm215_vm0, %v201_v15  ;;  %569 = vmatmul.msk.f32.gmra.mxu3 %vm215_vm0, %v205_v16  ;;  %v356_v16 = vadd.s32 80, %v775_v24  ;;  %vm387_vm9 = vcmp.lt.s32.totalorder %v371_v13, 256 }
  0x30   : > { %v374_v36 = vadd.s32 %v788_v31, %v356_v16 }
  0x32   : > { %vm390_vm12 = vcmp.lt.s32.totalorder %v374_v36, 256 }
  0x34   : > { %558 = vmatmul.msk.f32.gmra.mxu0 %vm215_vm0, %v194_v17  ;;  %562 = vmatmul.msk.f32.gmra.mxu1 %vm215_vm0, %v198_v18 }
  0x36   : > { %566 = vmatmul.msk.f32.gmra.mxu2 %vm215_vm0, %v202_v19  ;;  %570 = vmatmul.msk.f32.gmra.mxu3 %vm215_vm0, %v206_v20  ;;  %v357_v20 = vadd.s32 88, %v775_v24 }
  0x99   : > { %v281_v21 = vpop.f32.mrf.mxu0  ;;  %v293_v22 = vpop.f32.mrf.mxu1 }
  0x9a   : > { %v282_v37 = vadd.f32 %v786_v30, %v281_v21  ;;  %v294_v53 = vadd.f32 %v786_v30, %v293_v22 }
  0x9c   : > { %v329_v50 = vmax.f32 %v282_v37, 0.0  ;;  %v333_v1 = vmax.f32 %v294_v53, 0.0  ;;  %v360_v53 = vadd.s32 112, %v775_v24 }
  0x9e   : > { %v396_v60 = vsel %vm380_vm2, %v329_v50, 0.0  ;;  %v400_v18 = vsel %vm384_vm4, %v333_v1, 0.0  ;;  %v378_v58 = vadd.s32 %v788_v31, %v360_v53 }
  0x9f   : > { %v437_v10 = vmul.f32 %v396_v60, %v396_v60  ;;  %v441_v37 = vmul.f32 %v400_v18, %v400_v18 }
  0xa0   : > { %vm394_vm15 = vcmp.lt.s32.totalorder %v378_v58, 256 }
  0xa1   : > { %v284_v25 = vpop.f32.mrf.mxu0  ;;  %v296_v26 = vpop.f32.mrf.mxu1 }
  0xa2   : > { %v778_v27 = vpop.f32.mrf.mxu2  ;;  %v780_v28 = vpop.f32.mrf.mxu3  ;;  %v285_v33 = vadd.f32 %v786_v30, %v284_v25  ;;  %v297_v62 = vadd.f32 %v786_v30, %v296_v26 }
  0xa3   : > { %v306_v22 = vadd.f32 %v786_v30, %v778_v27  ;;  %v375_v27 = vadd.s32 %v788_v31, %v357_v20 }
  0xa4   : > { %v330_v42 = vmax.f32 %v285_v33, 0.0  ;;  %v334_v14 = vmax.f32 %v297_v62, 0.0 }
  0xa5   : > { %v337_v40 = vmax.f32 %v306_v22, 0.0  ;;  %vm391_vm13 = vcmp.lt.s32.totalorder %v375_v27, 256 }
  0xa6   : > { %v397_v56 = vsel %vm381_vm1, %v330_v42, 0.0  ;;  %v401_v34 = vsel %vm385_vm5, %v334_v14, 0.0 }
  0xa7   : > { %v438_v0 = vmul.f32 %v397_v56, %v397_v56  ;;  %v413_v11 = vadd.f32 %v397_v56, %v396_v60  ;;  %v442_v46 = vmul.f32 %v401_v34, %v401_v34  ;;  %v404_v59 = vsel %vm388_vm7, %v337_v40, 0.0 }
  0xa9   : > { %v287_v39 = vpop.f32.mrf.mxu0  ;;  %v299_v41 = vpop.f32.mrf.mxu1  ;;  %v453_v17 = vadd.f32 %v438_v0, %v437_v10 }
  0xaa   : > { %v288_v43 = vadd.f32 %v786_v30, %v287_v39  ;;  %v308_v45 = vpop.f32.mrf.mxu2  ;;  %v804_v49 = vpop.f32.mrf.mxu3  ;;  %v300_v7 = vadd.f32 %v786_v30, %v299_v41 }
  0xab   : > { %v309_v35 = vadd.f32 %v786_v30, %v308_v45 }
  0xac   : > { %v331_v51 = vmax.f32 %v288_v43, 0.0  ;;  %v335_v25 = vmax.f32 %v300_v7, 0.0 }
  0xad   : > { %v338_v50 = vmax.f32 %v309_v35, 0.0 }
  0xae   : > { %v398_v61 = vsel %vm382_vm3, %v331_v51, 0.0  ;;  %v402_v41 = vsel %vm386_vm8, %v335_v25, 0.0  ;;  %v318_v51 = vadd.f32 %v786_v30, %v780_v28  ;;  %v361_v28 = vadd.s32 120, %v775_v24 }
  0xaf   : > { %v439_v12 = vmul.f32 %v398_v61, %v398_v61  ;;  %v414_v19 = vadd.f32 %v413_v11, %v398_v61  ;;  %v443_v55 = vmul.f32 %v402_v41, %v402_v41  ;;  %v405_v1 = vsel %vm389_vm10, %v338_v50, 0.0 }
  0xb0   : > { %v341_v7 = vmax.f32 %v318_v51, 0.0  ;;  %v446_v13 = vmul.f32 %v405_v1, %v405_v1 }
  0xb1   : > { %v290_v2 = vpop.f32.mrf.mxu0  ;;  %v302_v5 = vpop.f32.mrf.mxu1  ;;  %v454_v29 = vadd.f32 %v453_v17, %v439_v12 }
  0xb2   : > { %v291_v6 = vadd.f32 %v786_v30, %v290_v2  ;;  %v303_v8 = vadd.f32 %v786_v30, %v302_v5  ;;  %v311_v9 = vpop.f32.mrf.mxu2  ;;  %v323_v21 = vpop.f32.mrf.mxu3  ;;  %v321_v2 = vadd.f32 %v786_v30, %v804_v49  ;;  %v377_v5 = vadd.s32 %v788_v31, %v359_v52  ;;  %v412_v52 = vld [vmem:[#allocation2] sm:$0x1] }
  0xb3   : > { %v312_v43 = vadd.f32 %v786_v30, %v311_v9  ;;  %v324_v12 = vadd.f32 %v786_v30, %v323_v21  ;;  %v408_v20 = vsel %vm392_vm11, %v341_v7, 0.0 }
  0xb4   : > { %v332_v15 = vmax.f32 %v291_v6, 0.0  ;;  %v336_v26 = vmax.f32 %v303_v8, 0.0  ;;  %v445_v6 = vmul.f32 %v404_v59, %v404_v59  ;;  %v342_v49 = vmax.f32 %v321_v2, 0.0 }
  0xb5   : > { %v339_v60 = vmax.f32 %v312_v43, 0.0  ;;  %vm393_vm14 = vcmp.lt.s32.totalorder %v377_v5, 256  ;;  %v343_v22 = vmax.f32 %v324_v12, 0.0 }
  0xb6   : > { %v399_v23 = vsel %vm383_vm6, %v332_v15, 0.0  ;;  %v403_v42 = vsel %vm387_vm9, %v336_v26, 0.0  ;;  %v379_v15 = vadd.s32 %v788_v31, %v361_v28  ;;  %v449_v26 = vmul.f32 %v408_v20, %v408_v20 }
  0xb7   : > { %v415_v32 = vadd.f32 %v414_v19, %v399_v23  ;;  %v440_v33 = vmul.f32 %v399_v23, %v399_v23  ;;  %v444_v57 = vmul.f32 %v403_v42, %v403_v42  ;;  %v406_v10 = vsel %vm390_vm12, %v339_v60, 0.0 }
  0xb8   : > { %v447_v17 = vmul.f32 %v406_v10, %v406_v10  ;;  %vm395_vm0 = vcmp.lt.s32.totalorder %v379_v15, 256  ;;  %v410_v31 = vsel %vm394_vm15, %v343_v22, 0.0 }
  0xb9   : > { %v416_v38 = vadd.f32 %v415_v32, %v400_v18  ;;  %v455_v39 = vadd.f32 %v454_v29, %v440_v33 }
  0xba   : > { %v314_v44 = vpop.f32.mrf.mxu2  ;;  %v326_v0 = vpop.f32.mrf.mxu3 }
  0xbb   : > { %v456_v47 = vadd.f32 %v455_v39, %v441_v37  ;;  %v417_v48 = vadd.f32 %v416_v38, %v401_v34  ;;  %v315_v45 = vadd.f32 %v786_v30, %v314_v44  ;;  %v327_v24 = vadd.f32 %v786_v30, %v326_v0 }
  0xbc   : > { %v409_v30 = vsel %vm393_vm14, %v342_v49, 0.0  ;;  %v451_v38 = vmul.f32 %v410_v31, %v410_v31 }
  0xbd   : > { %v418_v54 = vadd.f32 %v417_v48, %v402_v41  ;;  %v457_v56 = vadd.f32 %v456_v47, %v442_v46  ;;  %v340_v61 = vmax.f32 %v315_v45, 0.0  ;;  %v344_v23 = vmax.f32 %v327_v24, 0.0 }
  0xbe   : > { %v450_v34 = vmul.f32 %v409_v30, %v409_v30 }
  0xbf   : > { %v458_v62 = vadd.f32 %v457_v56, %v443_v55  ;;  %v419_v63 = vadd.f32 %v418_v54, %v403_v42  ;;  %v407_v11 = vsel %vm391_vm13, %v340_v61, 0.0  ;;  %v411_v33 = vsel %vm395_vm0, %v344_v23, 0.0  ;;  %v436_v55 = vld [vmem:[#allocation4] sm:$0x1] }
  0xc0   : > { %v448_v19 = vmul.f32 %v407_v11, %v407_v11  ;;  %v452_v4 = vmul.f32 %v411_v33, %v411_v33 }
  0xc1   : > { %v420_v8 = vadd.f32 %v419_v63, %v404_v59  ;;  %v459_v9 = vadd.f32 %v458_v62, %v444_v57 }
  0xc3   : > { %v460_v3 = vadd.f32 %v459_v9, %v445_v6  ;;  %v421_v14 = vadd.f32 %v420_v8, %v405_v1 }
  0xc5   : > { %v422_v16 = vadd.f32 %v421_v14, %v406_v10  ;;  %v461_v18 = vadd.f32 %v460_v3, %v446_v13 }
  0xc7   : > { %v462_v25 = vadd.f32 %v461_v18, %v447_v17  ;;  %v423_v21 = vadd.f32 %v422_v16, %v407_v11 }
  0xc9   : > { %v424_v29 = vadd.f32 %v423_v21, %v408_v20  ;;  %v463_v32 = vadd.f32 %v462_v25, %v448_v19 }
  0xcb   : > { %v464_v35 = vadd.f32 %v463_v32, %v449_v26  ;;  %v425_v36 = vadd.f32 %v424_v29, %v409_v30 }
  0xcd   : > { %v426_v37 = vadd.f32 %v425_v36, %v410_v31  ;;  %v465_v39 = vadd.f32 %v464_v35, %v450_v34 }
  0xcf   : > { %v466_v27 = vadd.f32 %v465_v39, %v451_v38  ;;  %v427_v40 = vadd.f32 %v426_v37, %v411_v33 }
  0xd1   : > { %v428_v41 = vrot.slane %v427_v40, 4  ;;  %v467_v42 = vadd.f32 %v466_v27, %v452_v4 }
  0xd3   : > { %v429_v43 = vadd.f32 %v428_v41, %v427_v40  ;;  %v468_v44 = vrot.slane %v467_v42, 4 }
  0xd5   : > { %v430_v46 = vrot.slane %v429_v43, 2  ;;  %v469_v47 = vadd.f32 %v468_v44, %v467_v42 }
  0xd7   : > { %v431_v48 = vadd.f32 %v430_v46, %v429_v43  ;;  %v470_v45 = vrot.slane %v469_v47, 2 }
  0xd9   : > { %v432_v50 = vrot.slane %v431_v48, 1  ;;  %v471_v51 = vadd.f32 %v470_v45, %v469_v47 }
  0xdb   : > { %v433_v53 = vadd.f32 %v432_v50, %v431_v48  ;;  %v472_v54 = vrot.slane %v471_v51, 1 }
  0xdd   : > { %v434_v56 = vadd.f32 %v433_v53, %v412_v52  ;;  %v473_v57 = vadd.f32 %v472_v54, %v471_v51 }
  0xdf   : > { %435 = vst [vmem:[#allocation2] sm:$0x1] %v434_v56  ;;  %v474_v59 = vadd.f32 %v473_v57, %v436_v55 }
  0xe0   : > { %591 = dma.vmem_to_hbm [thread:$0]  (%p598_p5), %s483_s8, 16, %s485_s11, [#allocation3]  }
  0xe1   : > { %475 = vst [vmem:[#allocation4] sm:$0x1] %v474_v59 }
  0xe2   : > { %593 = dma.vmem_to_hbm [thread:$0]  (%p598_p5), %s495_s13, 16, %s497_s18, [#allocation5]  }
  0xe3   : > { %675 = dma.done.wait (%p598_p5), [#allocation3], 16  }
  0xe4   : > { %677 = vsyncadd (%p598_p5), [#allocation3], 4294967280 }
  0xe5   : > { %679 = dma.done.wait (%p598_p5), [#allocation5], 16  }
  0xe6   : > { %681 = vsyncadd (%p598_p5), [#allocation5], 4294967280 }
  0xe7 PF: > { %s17_s15 = sadd.s32 1, %s684_s15  }
  0xe8   : > { %p14_p6 = scmp.ge.s32.totalorder %s17_s15, 4  }
  0xea   :  { %16 = sbr.rel (!%p14_p6) target bundleno = 2 (0x2), region = 71 }
  0xef   :  { %515 = vsyncpa [#allocation3], 1 }
  0xf0   :  { %517 = vsyncpa [#allocation3 + $0x1], 1 }
  0xf1   :  { %518 = vsyncpa [#allocation5], 1 }

</bundles_post_ra>
